<compile_context>
chip_gen: v7x
topology: tpu7x:2x2x1
jax: 0.10.0
libtpu: 0.0.40
codegen_flags: <defaults>
</compile_context>

<pallas_src>
import functools

import jax
import jax.numpy as jnp
from jax.experimental import pallas as pl
from jax.experimental.pallas import tpu as pltpu


def _round_up(x, m):
    return -(-x // m) * m


def _cdiv(a, b):
    return -(-a // b)


def _tpu_kind():
    try:
        return jax.devices()[0].device_kind.lower()
    except Exception:
        return ""


_KIND = _tpu_kind()
# bf16 VALU exists on v6e/v7x; keep elementwise chain in f32 on v5e and older.
_ELEM_DTYPE = jnp.bfloat16 if ("v6" in _KIND or "v7" in _KIND) else jnp.float32
# v7x has 2 TensorCores per chip: make sure the parallel batch axis can yield
# >=2 grid steps so both cores are used for mid-size batches.
_MIN_STEPS = 2 if "v7" in _KIND else 1


def _choose_tile(batch, block_b, min_steps):
    n_tiles = max(_cdiv(batch, block_b), min_steps, 1)
    tb = _round_up(_cdiv(batch, n_tiles), 16)   # multiple of 16 (bf16 packing)
    bp = _round_up(batch, tb)
    return tb, bp


def _classifier_kernel(z_ref, w1_ref, b1_ref, w2_ref, b2_ref, w3_ref, b3_ref,
                       out_ref):
    # Elementwise dtype for layers 1/2 is carried by the bias dtype:
    # bf16 on v6e/v7x (bf16 VALU), f32 on v5e.
    elem = b1_ref.dtype

    # ---- Layer 1: Linear(latent_dim -> 512) + LeakyReLU(0.2) ----
    x = z_ref[...].astype(jnp.bfloat16)
    h1 = jnp.dot(x, w1_ref[...], preferred_element_type=jnp.float32)
    h1 = h1.astype(elem) + b1_ref[...]            # (TB, 512) + (1, 512)
    h1 = jnp.maximum(h1, h1 * 0.2)                # LeakyReLU(0.2)

    # ---- Layer 2: Linear(512 -> 256) + LeakyReLU(0.2) ----
    h2 = jnp.dot(h1.astype(jnp.bfloat16), w2_ref[...],
                 preferred_element_type=jnp.float32)
    h2 = h2.astype(elem) + b2_ref[...]            # (TB, 256) + (1, 256)
    h2 = jnp.maximum(h2, h2 * 0.2)

    # ---- Layer 3: Linear(256 -> padded classes), bias add in f32 ----
    logits = jnp.dot(h2.astype(jnp.bfloat16), w3_ref[...],
                     preferred_element_type=jnp.float32)
    logits = logits + b3_ref[...]                 # padded cols carry -1e30 bias

    # ---- Softmax over dim=1 on the lane-dense padded tile (f32) ----
    m = jnp.max(logits, axis=1, keepdims=True)
    e = jnp.exp(logits - m)                       # padded cols -> exp(-huge) = 0
    denom = jnp.sum(e, axis=1, keepdims=True)
    # TODO(synk): if a downstream consumer takes log / NLL of these probs,
    # switch to exact division instead of the approximate reciprocal.
    out_ref[...] = (e * pl.reciprocal(denom, approx=True)).astype(out_ref.dtype)


def prepare_params(w1, b1, w2, b2, w3, b3, *, elem_dtype=None):
    """One-time weight prep (hoisted out of the per-call hot path):
    bf16 matmul weights, elem-dtype biases for layers 1/2, class dimension
    lane-padded to a multiple of 128 with -1e30 bias on padded columns."""
    if elem_dtype is None:
        elem_dtype = _ELEM_DTYPE
    num_classes = w3.shape[1]
    npad = _round_up(max(num_classes, 128), 128)

    w1 = jnp.asarray(w1, jnp.bfloat16)
    w2 = jnp.asarray(w2, jnp.bfloat16)
    b1 = jnp.asarray(b1, elem_dtype).reshape(1, -1)
    b2 = jnp.asarray(b2, elem_dtype).reshape(1, -1)

    w3p = (jnp.zeros((w3.shape[0], npad), jnp.bfloat16)
           .at[:, :num_classes].set(jnp.asarray(w3, jnp.bfloat16)))
    b3p = (jnp.full((1, npad), -1e30, jnp.float32)
           .at[:, :num_classes].set(jnp.asarray(b3, jnp.float32).reshape(1, -1)))
    return (w1, b1, w2, b2, w3p, b3p)


@functools.partial(jax.jit, static_argnames=("num_classes", "block_b", "min_steps"))
def classifier_forward(z, params, *, num_classes, block_b=1024,
                       min_steps=_MIN_STEPS):
    w1, b1, w2, b2, w3p, b3p = params
    B, latent_dim = z.shape
    npad = w3p.shape[1]

    tb, bp = _choose_tile(B, block_b, min_steps)
    zp = z if bp == B else jnp.pad(z, ((0, bp - B), (0, 0)))

    resident = lambda a: pl.BlockSpec(a.shape, lambda i: (0, 0))

    out = pl.pallas_call(
        _classifier_kernel,
        out_shape=jax.ShapeDtypeStruct((bp, npad), jnp.bfloat16),
        grid=(bp // tb,),
        in_specs=[
            pl.BlockSpec((tb, latent_dim), lambda i: (i, 0)),  # z: pipelined
            resident(w1), resident(b1),                        # weights: resident
            resident(w2), resident(b2),
            resident(w3p), resident(b3p),
        ],
        out_specs=pl.BlockSpec((tb, npad), lambda i: (i, 0)),
        compiler_params=pltpu.CompilerParams(
            dimension_semantics=("parallel",)),
    )(zp, w1, b1, w2, b2, w3p, b3p)

    # Slice off batch/class padding and return f32 probabilities; fused by XLA
    # inside this jit, touching only the useful bytes.
    return out[:B, :num_classes].astype(jnp.float32)


def init_params(key, latent_dim, num_classes):
    """Deterministic init mimicking nn.Linear's U(-1/sqrt(fan_in), 1/sqrt(fan_in))."""
    dims = [(latent_dim, 512), (512, 256), (256, num_classes)]
    params = []
    for fan_in, fan_out in dims:
        kw, kb, key = jax.random.split(key, 3)
        bound = 1.0 / jnp.sqrt(jnp.float32(fan_in))
        w = jax.random.uniform(kw, (fan_in, fan_out), jnp.float32, -bound, bound)
        b = jax.random.uniform(kb, (fan_out,), jnp.float32, -bound, bound)
        params.extend([w, b])
    return params


def _reference(z, params, num_classes):
    """Pure-JAX reference mirroring the kernel's quantization choices."""
    w1, b1, w2, b2, w3p, b3p = params
    f32 = jnp.float32
    x = z.astype(jnp.bfloat16)
    h1 = jnp.dot(x, w1, preferred_element_type=f32).astype(b1.dtype) + b1
    h1 = jnp.maximum(h1, h1 * 0.2)
    h2 = jnp.dot(h1.astype(jnp.bfloat16), w2,
                 preferred_element_type=f32).astype(b2.dtype) + b2
    h2 = jnp.maximum(h2, h2 * 0.2)
    logits = jnp.dot(h2.astype(jnp.bfloat16), w3p,
                     preferred_element_type=f32) + b3p
    probs = jax.nn.softmax(logits, axis=1)
    return probs[:, :num_classes]


if __name__ == "__main__":
    latent_dim = 32
    num_classes = 2
    batch = 2

    key = jax.random.PRNGKey(0)
    kz, kp = jax.random.split(key)
    z = jax.random.normal(kz, (batch, latent_dim), jnp.float32)
    raw = init_params(kp, latent_dim, num_classes)
    params = prepare_params(*raw)   # one-time weight prep (outside hot path)

    out = classifier_forward(z, params, num_classes=num_classes)
    out = jax.block_until_ready(out)

    ref = _reference(z, params, num_classes)

    # sanity: shape, finite, softmax rows sum to ~1, matches reference
    # (bf16 matmuls/output + approximate reciprocal tolerances)
    assert out.shape == (batch, num_classes)
    assert bool(jnp.all(jnp.isfinite(out)))
    assert jnp.allclose(jnp.sum(out, axis=1), 1.0, atol=1e-2)
    assert jnp.allclose(out, ref, atol=1e-2, rtol=1e-2)

    print("KERNEL_OK")
</pallas_src>

<mosaic_0001>
module attributes {stable_mosaic.version = 11 : i64} {
  func.func @_classifier_kernel(%arg0: i32, %arg1: memref<16x32xf32, #tpu.memory_space<vmem>>, %arg2: memref<32x512xbf16, #tpu.memory_space<vmem>>, %arg3: memref<1x512xf32, #tpu.memory_space<vmem>>, %arg4: memref<512x256xbf16, #tpu.memory_space<vmem>>, %arg5: memref<1x256xf32, #tpu.memory_space<vmem>>, %arg6: memref<256x128xbf16, #tpu.memory_space<vmem>>, %arg7: memref<1x128xf32, #tpu.memory_space<vmem>>, %arg8: memref<16x128xbf16, #tpu.memory_space<vmem>>) attributes {dimension_semantics = [#tpu.dimension_semantics<parallel>], iteration_bounds = array<i64: 1>, scalar_prefetch = 0 : i64, scratch_operands = 0 : i64, tpu.core_type = #tpu.core_type<tc>, window_params = [{transform_indices = @transform_0, window_bounds = array<i64: 16, 32>}, {pipeline_mode = #tpu.pipeline_mode<synchronous>, transform_indices = @transform_1, window_bounds = array<i64: 32, 512>}, {pipeline_mode = #tpu.pipeline_mode<synchronous>, transform_indices = @transform_2, window_bounds = array<i64: 1, 512>}, {pipeline_mode = #tpu.pipeline_mode<synchronous>, transform_indices = @transform_3, window_bounds = array<i64: 512, 256>}, {pipeline_mode = #tpu.pipeline_mode<synchronous>, transform_indices = @transform_4, window_bounds = array<i64: 1, 256>}, {pipeline_mode = #tpu.pipeline_mode<synchronous>, transform_indices = @transform_5, window_bounds = array<i64: 256, 128>}, {pipeline_mode = #tpu.pipeline_mode<synchronous>, transform_indices = @transform_6, window_bounds = array<i64: 1, 128>}, {transform_indices = @transform_7, window_bounds = array<i64: 16, 128>}]} {
    %c0 = arith.constant 0 : index
    %c0_0 = arith.constant 0 : index
    %0 = vector.load %arg1[%c0, %c0_0] : memref<16x32xf32, #tpu.memory_space<vmem>>, vector<16x32xf32>
    %1 = arith.truncf %0 : vector<16x32xf32> to vector<16x32xbf16>
    %c0_1 = arith.constant 0 : index
    %c0_2 = arith.constant 0 : index
    %2 = vector.load %arg2[%c0_1, %c0_2] : memref<32x512xbf16, #tpu.memory_space<vmem>>, vector<32x512xbf16>
    %cst = arith.constant dense<0.000000e+00> : vector<16x512xf32>
    %3 = tpu.matmul %1, %2, %cst {dimension_numbers = #tpu.dot_dimension_numbers<[1], [0], [0], [1], [0, 0, 1, 1], [], []>} : vector<16x32xbf16>, vector<32x512xbf16>, vector<16x512xf32> -> vector<16x512xf32>
    %c0_3 = arith.constant 0 : index
    %c0_4 = arith.constant 0 : index
    %4 = vector.load %arg3[%c0_3, %c0_4] : memref<1x512xf32, #tpu.memory_space<vmem>>, vector<1x512xf32>
    %5 = vector.broadcast %4 : vector<1x512xf32> to vector<16x512xf32>
    %6 = arith.addf %3, %5 : vector<16x512xf32>
    %cst_5 = arith.constant 2.000000e-01 : f32
    %7 = vector.broadcast %cst_5 : f32 to vector<16x512xf32>
    %8 = arith.mulf %6, %7 : vector<16x512xf32>
    %9 = arith.maximumf %6, %8 : vector<16x512xf32>
    %10 = arith.truncf %9 : vector<16x512xf32> to vector<16x512xbf16>
    %c0_6 = arith.constant 0 : index
    %c0_7 = arith.constant 0 : index
    %11 = vector.load %arg4[%c0_6, %c0_7] : memref<512x256xbf16, #tpu.memory_space<vmem>>, vector<512x256xbf16>
    %cst_8 = arith.constant dense<0.000000e+00> : vector<16x256xf32>
    %12 = tpu.matmul %10, %11, %cst_8 {dimension_numbers = #tpu.dot_dimension_numbers<[1], [0], [0], [1], [0, 0, 1, 1], [], []>} : vector<16x512xbf16>, vector<512x256xbf16>, vector<16x256xf32> -> vector<16x256xf32>
    %c0_9 = arith.constant 0 : index
    %c0_10 = arith.constant 0 : index
    %13 = vector.load %arg5[%c0_9, %c0_10] : memref<1x256xf32, #tpu.memory_space<vmem>>, vector<1x256xf32>
    %14 = vector.broadcast %13 : vector<1x256xf32> to vector<16x256xf32>
    %15 = arith.addf %12, %14 : vector<16x256xf32>
    %cst_11 = arith.constant 2.000000e-01 : f32
    %16 = vector.broadcast %cst_11 : f32 to vector<16x256xf32>
    %17 = arith.mulf %15, %16 : vector<16x256xf32>
    %18 = arith.maximumf %15, %17 : vector<16x256xf32>
    %19 = arith.truncf %18 : vector<16x256xf32> to vector<16x256xbf16>
    %c0_12 = arith.constant 0 : index
    %c0_13 = arith.constant 0 : index
    %20 = vector.load %arg6[%c0_12, %c0_13] : memref<256x128xbf16, #tpu.memory_space<vmem>>, vector<256x128xbf16>
    %cst_14 = arith.constant dense<0.000000e+00> : vector<16x128xf32>
    %21 = tpu.matmul %19, %20, %cst_14 {dimension_numbers = #tpu.dot_dimension_numbers<[1], [0], [0], [1], [0, 0, 1, 1], [], []>} : vector<16x256xbf16>, vector<256x128xbf16>, vector<16x128xf32> -> vector<16x128xf32>
    %c0_15 = arith.constant 0 : index
    %c0_16 = arith.constant 0 : index
    %22 = vector.load %arg7[%c0_15, %c0_16] : memref<1x128xf32, #tpu.memory_space<vmem>>, vector<1x128xf32>
    %23 = vector.broadcast %22 : vector<1x128xf32> to vector<16x128xf32>
    %24 = arith.addf %21, %23 : vector<16x128xf32>
    %cst_17 = arith.constant dense<0xFF800000> : vector<16xf32>
    %25 = vector.multi_reduction <maximumf>, %24, %cst_17 [1] : vector<16x128xf32> to vector<16xf32>
    %26 = vector.shape_cast %25 : vector<16xf32> to vector<16x1xf32>
    %27 = vector.broadcast %26 : vector<16x1xf32> to vector<16x128xf32>
    %28 = arith.subf %24, %27 : vector<16x128xf32>
    %29 = math.exp %28 : vector<16x128xf32>
    %cst_18 = arith.constant dense<0.000000e+00> : vector<16xf32>
    %30 = vector.multi_reduction <add>, %29, %cst_18 [1] : vector<16x128xf32> to vector<16xf32>
    %31 = vector.shape_cast %30 : vector<16xf32> to vector<16x1xf32>
    %32 = tpu.reciprocal %31 {approx = true} : vector<16x1xf32> -> vector<16x1xf32>
    %33 = vector.broadcast %32 : vector<16x1xf32> to vector<16x128xf32>
    %34 = arith.mulf %29, %33 : vector<16x128xf32>
    %35 = arith.truncf %34 : vector<16x128xf32> to vector<16x128xbf16>
    %c0_19 = arith.constant 0 : index
    %c0_20 = arith.constant 0 : index
    %36 = vector.load %arg8[%c0_19, %c0_20] : memref<16x128xbf16, #tpu.memory_space<vmem>>, vector<16x128xbf16>
    tpu.vector_store %arg8[%c0_19, %c0_20], %35 {strides = array<i32>} : memref<16x128xbf16, #tpu.memory_space<vmem>>, vector<16x128xbf16>,
    return
  }
  func.func @transform_0(%arg0: i32) -> (i32, i32) {
    %c0_i32 = arith.constant 0 : i32
    %c0_i32_0 = arith.constant 0 : i32
    return %arg0, %c0_i32 : i32, i32
  }
  func.func @transform_1(%arg0: i32) -> (i32, i32) {
    %c0_i32 = arith.constant 0 : i32
    %c0_i32_0 = arith.constant 0 : i32
    %c0_i32_1 = arith.constant 0 : i32
    return %c0_i32, %c0_i32_0 : i32, i32
  }
  func.func @transform_2(%arg0: i32) -> (i32, i32) {
    %c0_i32 = arith.constant 0 : i32
    %c0_i32_0 = arith.constant 0 : i32
    %c0_i32_1 = arith.constant 0 : i32
    return %c0_i32, %c0_i32_0 : i32, i32
  }
  func.func @transform_3(%arg0: i32) -> (i32, i32) {
    %c0_i32 = arith.constant 0 : i32
    %c0_i32_0 = arith.constant 0 : i32
    %c0_i32_1 = arith.constant 0 : i32
    return %c0_i32, %c0_i32_0 : i32, i32
  }
  func.func @transform_4(%arg0: i32) -> (i32, i32) {
    %c0_i32 = arith.constant 0 : i32
    %c0_i32_0 = arith.constant 0 : i32
    %c0_i32_1 = arith.constant 0 : i32
    return %c0_i32, %c0_i32_0 : i32, i32
  }
  func.func @transform_5(%arg0: i32) -> (i32, i32) {
    %c0_i32 = arith.constant 0 : i32
    %c0_i32_0 = arith.constant 0 : i32
    %c0_i32_1 = arith.constant 0 : i32
    return %c0_i32, %c0_i32_0 : i32, i32
  }
  func.func @transform_6(%arg0: i32) -> (i32, i32) {
    %c0_i32 = arith.constant 0 : i32
    %c0_i32_0 = arith.constant 0 : i32
    %c0_i32_1 = arith.constant 0 : i32
    return %c0_i32, %c0_i32_0 : i32, i32
  }
  func.func @transform_7(%arg0: i32) -> (i32, i32) {
    %c0_i32 = arith.constant 0 : i32
    %c0_i32_0 = arith.constant 0 : i32
    return %arg0, %c0_i32 : i32, i32
  }
}

</mosaic_0001>

<bundles_post_ra>
// kernel: classifier_forward.1
= control target key start
LH: loop header
LB: loop body
LE: loop exit
PB: predicated region body
PF: predicated region fallthrough
CT: control target
= control target key end

     0   :  { %12 = vsyncpa [#allocation3], 0  ;;  %s1415_s0 = inlined_call_operand.vmem [shape: f32[16,32], index: 0, kind: input, shape index: {}]   ;;  %s1416_s1 = inlined_call_operand.hbm [shape: bf16[32,512], index: 1, kind: input, shape index: {}]   ;;  %s1417_s2 = inlined_call_operand.vmem [shape: f32[1,512], index: 2, kind: input, shape index: {}]   ;;  %s1418_s3 = inlined_call_operand.hbm [shape: bf16[512,256], index: 3, kind: input, shape index: {}]   ;;  %s1419_s4 = inlined_call_operand.vmem [shape: f32[1,256], index: 4, kind: input, shape index: {}]   ;;  %s1420_s5 = inlined_call_operand.hbm [shape: bf16[256,128], index: 5, kind: input, shape index: {}]   ;;  %s1421_s6 = inlined_call_operand.vmem [shape: f32[1,128], index: 6, kind: input, shape index: {}]   ;;  %s1422_s7 = inlined_call_operand.vmem [shape: bf16[16,128], index: 7, kind: output, shape index: {}]  }
   0x1   :  { %13 = vsyncpa [#allocation5], 0  ;;  %s1295_s24 = smov [#allocation4]   ;;  %s1225_s28 = scalar_lea.hbm %s1418_s3, 8192 }
   0x2   :  { %s35_s25 = sshll.u32 %s1295_s24, 4  ;;  %p1226_p0 = scmp.ne.s32.totalorder %s1418_s3, %s1225_s28  ;;  %s36_s25 = int_to_ptr.vmem [resolvable:$true] %s35_s25 }
   0x3   :  { %p1229_p1 = scmp.lt.u32.totalorder %s1225_s28, %s1418_s3 }
   0x5   :  { %p1231_p2 = pnand %p1229_p1, %p1226_p0 }
   0x7   :  { %1234 = shalt.err (!%p1231_p2)
}
   0x8   :  { %s1235_s10 = scalar_lea.vmem %s36_s25, 8192  ;;  %p1240_p4 = scmp.lt.s32.totalorder %s36_s25, %s36_s25 }
   0x9   :  { %p1236_p3 = scmp.ne.s32.totalorder %s36_s25, %s1235_s10  ;;  %p1241_p5 = scmp.lt.s32.totalorder %s1235_s10, %s1235_s10 }
   0xb   :  { %p1242_p6 = por %p1241_p5, %p1240_p4 }
   0xd   :  { %p1243_p7 = pnand %p1242_p6, %p1236_p3 }
   0xf   :  { %1246 = shalt.err (!%p1243_p7)
}
  0x10   :  { %s1296_s11 = smov 128   ;;  %s1297_s12 = smov 8  }
  0x11   :  { %41 = dma.hbm_to_vmem [thread:$0]  %s1418_s3, 8192, %s36_s25, [#allocation5], %s1296_s11, %s1296_s11, %s1297_s12  }
  0x12   :  { %s1298_s15 = smov [#allocation2]   ;;  %s1247_s19 = scalar_lea.hbm %s1416_s1, 1024 }
  0x13   :  { %s21_s16 = sshll.u32 %s1298_s15, 4  ;;  %p1248_p8 = scmp.ne.s32.totalorder %s1416_s1, %s1247_s19  ;;  %s22_s16 = int_to_ptr.vmem [resolvable:$true] %s21_s16 }
  0x14   :  { %p1251_p9 = scmp.lt.u32.totalorder %s1247_s19, %s1416_s1 }
  0x16   :  { %p1253_p10 = pnand %p1251_p9, %p1248_p8 }
  0x18   :  { %1256 = shalt.err (!%p1253_p10)
}
  0x19   :  { %s1257_s24 = scalar_lea.vmem %s22_s16, 1024  ;;  %p1262_p12 = scmp.lt.s32.totalorder %s22_s16, %s22_s16 }
  0x1a   :  { %p1258_p11 = scmp.ne.s32.totalorder %s22_s16, %s1257_s24  ;;  %p1263_p13 = scmp.lt.s32.totalorder %s1257_s24, %s1257_s24 }
  0x1c   :  { %p1264_p0 = por %p1263_p13, %p1262_p12 }
  0x1e   :  { %p1265_p1 = pnand %p1264_p0, %p1258_p11 }
  0x20   :  { %1268 = shalt.err (!%p1265_p1)
}
  0x21   :  { %s1299_s3 = smov 256   ;;  %s1300_s25 = smov 16  }
  0x22   :  { %27 = dma.hbm_to_vmem [thread:$0]  %s1416_s1, 1024, %s22_s16, [#allocation3], %s1299_s3, %s1299_s3, %s1300_s25  }
  0x23   :  { %s1301_s28 = smov [#allocation6]   ;;  %s1269_s9 = scalar_lea.hbm %s1420_s5, 2048 }
  0x24   :  { %s49_s29 = sshll.u32 %s1301_s28, 4  ;;  %p1270_p2 = scmp.ne.s32.totalorder %s1420_s5, %s1269_s9  ;;  %s50_s29 = int_to_ptr.vmem [resolvable:$true] %s49_s29 }
  0x25   :  { %p1273_p3 = scmp.lt.u32.totalorder %s1269_s9, %s1420_s5 }
  0x27   :  { %p1275_p4 = pnand %p1273_p3, %p1270_p2 }
  0x29   :  { %1278 = shalt.err (!%p1275_p4)
}
  0x2a   :  { %s1279_s14 = scalar_lea.vmem %s50_s29, 2048  ;;  %p1284_p6 = scmp.lt.s32.totalorder %s50_s29, %s50_s29 }
  0x2b   :  { %p1280_p5 = scmp.ne.s32.totalorder %s50_s29, %s1279_s14  ;;  %p1285_p7 = scmp.lt.s32.totalorder %s1279_s14, %s1279_s14 }
  0x2d   :  { %p1286_p8 = por %p1285_p7, %p1284_p6 }
  0x2f   :  { %p1287_p9 = pnand %p1286_p8, %p1280_p5 }
  0x31   :  { %1290 = shalt.err (!%p1287_p9)
}
  0x32   :  { %s1302_s1 = smov 64   ;;  %s1303_s15 = smov 4  }
  0x33   :  { %55 = dma.hbm_to_vmem [thread:$0]  %s1420_s5, 2048, %s50_s29, [#allocation5], %s1302_s1, %s1302_s1, %s1303_s15  }
  0x34   :  { %1291 = dma.done.wait [#allocation3], 1024  }
  0x35   :  { %1292 = vsyncadd [#allocation3], 4294966272 }
  0x36   :  { %1293 = dma.done.wait [#allocation5], 10240  }
  0x37   :  { %1294 = vsyncadd [#allocation5], 4294957056  ;;  %v1304_v0 = vmov 0   ;;  %v1093_v1 = vld [vmem:[#allocation2 + $0x4] ss:$16 sps:$4 sm:$0xff]   ;;  %v69_v6 = vld [vmem:[%s1415_s0 + $0x8] sm:$0xff] }
  0x38   :  { %177 = vmatprep.mubr.bf16.mxu0 %v1304_v0  ;;  %v1095_v2 = vld [vmem:[#allocation2] ss:$16 sps:$4 sm:$0xff]   ;;  %145 = vmatprep.subr.bf16.mxu0 %v1093_v1  ;;  %v1096_v3 = vld [vmem:[#allocation2 + $0x24] ss:$16 sps:$4 sm:$0xff]   ;;  %v1101_v7 = vld [vmem:[#allocation2 + $0xc] ss:$16 sps:$4 sm:$0xff]  }
  0x39   :  { %v1098_v4 = vld [vmem:[#allocation2 + $0x20] ss:$16 sps:$4 sm:$0xff]   ;;  %146 = vmatpush1.bf16.msra.mxu0 %v1095_v2  ;;  %v1099_v8 = vld [vmem:[#allocation2 + $0x8] ss:$16 sps:$4 sm:$0xff]   ;;  %v1105_v10 = vld [vmem:[#allocation4 + $0x4] ss:$8 sps:$4 sm:$0xff]  }
  0x3a   :  { %v68_v5 = vld [vmem:[%s1415_s0] sm:$0xff]  ;;  %147 = vmatprep.subr.bf16.mxu0 %v1096_v3  ;;  %vm141_vm0 = vcmask 261120   ;;  %v1104_v12 = vld [vmem:[#allocation2 + $0x2c] ss:$16 sps:$4 sm:$0xff]   ;;  %647 = vmatprep.subr.bf16.mxu1 %v1105_v10  ;;  %v1110_v14 = vld [vmem:[#allocation4 + $0x10] ss:$8 sps:$4 sm:$0xff]  }
  0x3b   :  { %v70_v9 = vpack.c.bf16 %v69_v6, %v68_v5  ;;  %v1107_v11 = vld [vmem:[#allocation4] ss:$8 sps:$4 sm:$0xff]   ;;  %v1108_v13 = vld [vmem:[#allocation4 + $0x14] ss:$8 sps:$4 sm:$0xff]   ;;  %v1111_v15 = vld [vmem:[#allocation4 + $0x24] ss:$8 sps:$4 sm:$0xff]  }
  0x3c   :  { %648 = vmatpush1.bf16.msra.mxu1 %v1107_v11  ;;  %v1102_v16 = vld [vmem:[#allocation2 + $0x28] ss:$16 sps:$4 sm:$0xff]   ;;  %v1115_v17 = vld [vmem:[#allocation4 + $0x104] ss:$8 sps:$4 sm:$0xff]   ;;  %v1117_v19 = vld [vmem:[#allocation4 + $0x34] ss:$8 sps:$4 sm:$0xff]  }
  0x3d   :  { %148 = vmatpush1.bf16.msra.mxu0 %v1098_v4  ;;  %649 = vmatprep.subr.bf16.mxu1 %v1108_v13  ;;  %v1116_v18 = vld [vmem:[#allocation4 + $0x20] ss:$8 sps:$4 sm:$0xff]   ;;  %v1121_v21 = vld [vmem:[#allocation4 + $0x114] ss:$8 sps:$4 sm:$0xff]   ;;  %v1122_v22 = vld [vmem:[#allocation4 + $0x30] ss:$8 sps:$4 sm:$0xff]   ;;  %v81_v13 = vlaneseq }
  0x3e   :  { %188 = vmatprep.subr.bf16.mxu0 %v1101_v7  ;;  %v1113_v20 = vld [vmem:[#allocation4 + $0x100] ss:$8 sps:$4 sm:$0xff]   ;;  %v1123_v23 = vld [vmem:[#allocation4 + $0x44] ss:$8 sps:$4 sm:$0xff]   ;;  %v1119_v24 = vld [vmem:[#allocation4 + $0x110] ss:$8 sps:$4 sm:$0xff]  }
  0x3f   :  { %v1127_v25 = vld [vmem:[#allocation4 + $0x124] ss:$8 sps:$4 sm:$0xff]   ;;  %v1128_v26 = vld [vmem:[#allocation4 + $0x40] ss:$8 sps:$4 sm:$0xff]   ;;  %v1129_v27 = vld [vmem:[#allocation4 + $0x54] ss:$8 sps:$4 sm:$0xff]  }
  0x40   :  { %961 = vmatmul.mubr.msk.bf16.vlgmr.msra.gmra.mrb[0].mxu0 %vm141_vm0, %v70_v9  ;;  %650 = vmatpush1.bf16.msra.mxu1 %v1110_v14  ;;  %v1125_v28 = vld [vmem:[#allocation4 + $0x120] ss:$8 sps:$4 sm:$0xff]   ;;  %v1133_v29 = vld [vmem:[#allocation4 + $0x134] ss:$8 sps:$4 sm:$0xff]   ;;  %v1134_v30 = vld [vmem:[#allocation4 + $0x50] ss:$8 sps:$4 sm:$0xff]  }
  0x41   :  { %189 = vmatpush1.bf16.msra.mxu0 %v1099_v8  ;;  %220 = vmatprep.mubr.bf16.mxu0 %v1304_v0  ;;  %v1135_v31 = vld [vmem:[#allocation4 + $0x64] ss:$8 sps:$4 sm:$0xff]   ;;  %v1131_v32 = vld [vmem:[#allocation4 + $0x130] ss:$8 sps:$4 sm:$0xff]   ;;  %v1140_v34 = vld [vmem:[#allocation4 + $0x60] ss:$8 sps:$4 sm:$0xff]  }
  0x42   :  { %190 = vmatprep.subr.bf16.mxu0 %v1104_v12  ;;  %651 = vmatprep.subr.bf16.mxu1 %v1111_v15  ;;  %v1139_v33 = vld [vmem:[#allocation4 + $0x144] ss:$8 sps:$4 sm:$0xff]   ;;  %v1141_v35 = vld [vmem:[#allocation4 + $0x74] ss:$8 sps:$4 sm:$0xff]   ;;  %v1137_v36 = vld [vmem:[#allocation4 + $0x140] ss:$8 sps:$4 sm:$0xff]  }
  0x43   :  { %v1145_v37 = vld [vmem:[#allocation4 + $0x154] ss:$8 sps:$4 sm:$0xff]   ;;  %v1146_v38 = vld [vmem:[#allocation4 + $0x70] ss:$8 sps:$4 sm:$0xff]   ;;  %v1147_v39 = vld [vmem:[#allocation4 + $0x84] ss:$8 sps:$4 sm:$0xff]  }
  0x44   :  { %652 = vmatpush1.bf16.msra.mxu1 %v1116_v18  ;;  %v1143_v40 = vld [vmem:[#allocation4 + $0x150] ss:$8 sps:$4 sm:$0xff]   ;;  %v1151_v41 = vld [vmem:[#allocation4 + $0x164] ss:$8 sps:$4 sm:$0xff]   ;;  %v1149_v42 = vld [vmem:[#allocation4 + $0x160] ss:$8 sps:$4 sm:$0xff]  }
  0x45   :  { %191 = vmatpush1.bf16.msra.mxu0 %v1102_v16  ;;  %653 = vmatprep.subr.bf16.mxu1 %v1117_v19  ;;  %v1152_v43 = vld [vmem:[#allocation4 + $0x80] ss:$8 sps:$4 sm:$0xff]   ;;  %v1153_v44 = vld [vmem:[#allocation4 + $0x94] ss:$8 sps:$4 sm:$0xff]   ;;  %v1158_v46 = vld [vmem:[#allocation4 + $0x90] ss:$8 sps:$4 sm:$0xff]  }
  0x46   :  { %690 = vmatprep.subr.bf16.mxu0 %v1115_v17  ;;  %v1157_v45 = vld [vmem:[#allocation4 + $0x174] ss:$8 sps:$4 sm:$0xff]   ;;  %v1159_v47 = vld [vmem:[#allocation4 + $0xa4] ss:$8 sps:$4 sm:$0xff]   ;;  %v1155_v48 = vld [vmem:[#allocation4 + $0x170] ss:$8 sps:$4 sm:$0xff]  }
  0x47   :  { %v1163_v49 = vld [vmem:[#allocation4 + $0x184] ss:$8 sps:$4 sm:$0xff]   ;;  %v1164_v50 = vld [vmem:[#allocation4 + $0xa0] ss:$8 sps:$4 sm:$0xff]   ;;  %v1165_v51 = vld [vmem:[#allocation4 + $0xb4] ss:$8 sps:$4 sm:$0xff]  }
  0x48   :  { %962 = vmatmul.mubr.msk.bf16.vlgmr.msra.gmra.mrb[4].mxu0 %vm141_vm0, %v70_v9  ;;  %654 = vmatpush1.bf16.msra.mxu1 %v1122_v22  ;;  %v1161_v52 = vld [vmem:[#allocation4 + $0x180] ss:$8 sps:$4 sm:$0xff]   ;;  %v1169_v53 = vld [vmem:[#allocation4 + $0x194] ss:$8 sps:$4 sm:$0xff]   ;;  %v1170_v54 = vld [vmem:[#allocation4 + $0xb0] ss:$8 sps:$4 sm:$0xff]  }
  0x49   :  { %691 = vmatpush1.bf16.msra.mxu0 %v1113_v20  ;;  %655 = vmatprep.subr.bf16.mxu1 %v1123_v23  ;;  %v1171_v55 = vld [vmem:[#allocation4 + $0xc4] ss:$8 sps:$4 sm:$0xff]   ;;  %v1167_v56 = vld [vmem:[#allocation4 + $0x190] ss:$8 sps:$4 sm:$0xff]   ;;  %v1176_v58 = vld [vmem:[#allocation4 + $0xc0] ss:$8 sps:$4 sm:$0xff]  }
  0x4a   :  { %692 = vmatprep.subr.bf16.mxu0 %v1121_v21  ;;  %v1175_v57 = vld [vmem:[#allocation4 + $0x1a4] ss:$8 sps:$4 sm:$0xff]   ;;  %v1173_v59 = vld [vmem:[#allocation4 + $0x1a0] ss:$8 sps:$4 sm:$0xff]   ;;  %v1177_v60 = vld [vmem:[#allocation4 + $0xd4] ss:$8 sps:$4 sm:$0xff]  }
  0x4b   :  { %v1181_v61 = vld [vmem:[#allocation4 + $0x1b4] ss:$8 sps:$4 sm:$0xff]   ;;  %v1179_v62 = vld [vmem:[#allocation4 + $0x1b0] ss:$8 sps:$4 sm:$0xff]   ;;  %v1183_v0 = vld [vmem:[#allocation4 + $0xe4] ss:$8 sps:$4 sm:$0xff]  }
  0x4c   :  { %656 = vmatpush1.bf16.msra.mxu1 %v1128_v26  ;;  %v1182_v63 = vld [vmem:[#allocation4 + $0xd0] ss:$8 sps:$4 sm:$0xff]   ;;  %v1187_v1 = vld [vmem:[#allocation4 + $0x1c4] ss:$8 sps:$4 sm:$0xff]   ;;  %v1185_v2 = vld [vmem:[#allocation4 + $0x1c0] ss:$8 sps:$4 sm:$0xff]  }
  0x4d   :  { %693 = vmatpush1.bf16.msra.mxu0 %v1119_v24  ;;  %657 = vmatprep.subr.bf16.mxu1 %v1129_v27  ;;  %v1188_v3 = vld [vmem:[#allocation4 + $0xe0] ss:$8 sps:$4 sm:$0xff]   ;;  %v1189_v4 = vld [vmem:[#allocation4 + $0xf4] ss:$8 sps:$4 sm:$0xff]   ;;  %v1191_v6 = vld [vmem:[#allocation4 + $0x1d0] ss:$8 sps:$4 sm:$0xff]  }
  0x4e   :  { %694 = vmatprep.subr.bf16.mxu0 %v1127_v25  ;;  %v1193_v5 = vld [vmem:[#allocation4 + $0x1d4] ss:$8 sps:$4 sm:$0xff]   ;;  %v1194_v7 = vld [vmem:[#allocation4 + $0xf0] ss:$8 sps:$4 sm:$0xff]   ;;  %v1197_v8 = vld [vmem:[#allocation4 + $0x1e4] ss:$8 sps:$4 sm:$0xff]  }
  0x4f   :  { %v1195_v9 = vld [vmem:[#allocation4 + $0x1e0] ss:$8 sps:$4 sm:$0xff]   ;;  %v1200_v10 = vld [vmem:[#allocation4 + $0x1f4] ss:$8 sps:$4 sm:$0xff]   ;;  %v1198_v11 = vld [vmem:[#allocation4 + $0x1f0] ss:$8 sps:$4 sm:$0xff]  }
  0x50   :  { %658 = vmatpush1.bf16.msra.mxu1 %v1134_v30  ;;  %v1201_v12 = vld [vmem:[#allocation6 + $0x40] sm:$0xff]   ;;  %v1389_v14 = vshrl.u32 %v81_v13, 7 }
  0x51   :  { %695 = vmatpush1.bf16.msra.mxu0 %v1125_v28  ;;  %659 = vmatprep.subr.bf16.mxu1 %v1135_v31  ;;  %v79_v16 = vld [vmem:[%s1417_s2] sm:$0xf] }
  0x52   :  { %696 = vmatprep.subr.bf16.mxu0 %v1133_v29  ;;  %v83_v15 = vsub.s32 0, %v1389_v14  ;;  %v87_v17 = vsub.s32 1, %v1389_v14  ;;  %v91_v23 = vsub.s32 2, %v1389_v14  ;;  %v95_v26 = vsub.s32 3, %v1389_v14 }
  0x54   :  { %660 = vmatpush1.bf16.msra.mxu1 %v1140_v34  ;;  %v84_v18 = vrot.slane %v79_v16, %v83_v15  ;;  %v88_v19 = vrot.slane %v79_v16, %v87_v17 }
  0x55   :  { %697 = vmatpush1.bf16.msra.mxu0 %v1131_v32  ;;  %661 = vmatprep.subr.bf16.mxu1 %v1141_v35  ;;  %v96_v35 = vrot.slane %v79_v16, %v95_v26 }
  0x56   :  { %698 = vmatprep.subr.bf16.mxu0 %v1139_v33  ;;  %v92_v33 = vrot.slane %v79_v16, %v91_v23 }
  0x58   :  { %662 = vmatpush1.bf16.msra.mxu1 %v1146_v38 }
  0x59   :  { %699 = vmatpush1.bf16.msra.mxu0 %v1137_v36  ;;  %663 = vmatprep.subr.bf16.mxu1 %v1147_v39 }
  0x5a   :  { %700 = vmatprep.subr.bf16.mxu0 %v1145_v37 }
  0x5c   :  { %664 = vmatpush1.bf16.msra.mxu1 %v1152_v43 }
  0x5d   :  { %701 = vmatpush1.bf16.msra.mxu0 %v1143_v40  ;;  %665 = vmatprep.subr.bf16.mxu1 %v1153_v44 }
  0x5e   :  { %702 = vmatprep.subr.bf16.mxu0 %v1151_v41 }
  0x60   :  { %666 = vmatpush1.bf16.msra.mxu1 %v1158_v46 }
  0x61   :  { %703 = vmatpush1.bf16.msra.mxu0 %v1149_v42  ;;  %667 = vmatprep.subr.bf16.mxu1 %v1159_v47  ;;  %v1202_v47 = vld [vmem:[#allocation6] sm:$0xff]  }
  0x62   :  { %704 = vmatprep.subr.bf16.mxu0 %v1157_v45 }
  0x64   :  { %668 = vmatpush1.bf16.msra.mxu1 %v1164_v50 }
  0x65   :  { %705 = vmatpush1.bf16.msra.mxu0 %v1155_v48  ;;  %669 = vmatprep.subr.bf16.mxu1 %v1165_v51  ;;  %v1203_v51 = vld [vmem:[#allocation6 + $0x48] sm:$0xff]  }
  0x66   :  { %706 = vmatprep.subr.bf16.mxu0 %v1163_v49 }
  0x68   :  { %670 = vmatpush1.bf16.msra.mxu1 %v1170_v54 }
  0x69   :  { %707 = vmatpush1.bf16.msra.mxu0 %v1161_v52  ;;  %671 = vmatprep.subr.bf16.mxu1 %v1171_v55 }
  0x6a   :  { %708 = vmatprep.subr.bf16.mxu0 %v1169_v53 }
  0x6c   :  { %672 = vmatpush1.bf16.msra.mxu1 %v1176_v58 }
  0x6d   :  { %709 = vmatpush1.bf16.msra.mxu0 %v1167_v56  ;;  %673 = vmatprep.subr.bf16.mxu1 %v1177_v60  ;;  %v1204_v56 = vld [vmem:[#allocation6 + $0x8] sm:$0xff]  }
  0x6e   :  { %710 = vmatprep.subr.bf16.mxu0 %v1175_v57 }
  0x70   :  { %674 = vmatpush1.bf16.msra.mxu1 %v1182_v63 }
  0x71   :  { %711 = vmatpush1.bf16.msra.mxu0 %v1173_v59  ;;  %675 = vmatprep.subr.bf16.mxu1 %v1183_v0  ;;  %v1205_v59 = vld [vmem:[#allocation6 + $0x50] sm:$0xff]  }
  0x72   :  { %712 = vmatprep.subr.bf16.mxu0 %v1181_v61  ;;  %v1206_v0 = vld [vmem:[#allocation6 + $0x10] sm:$0xff]  }
  0x74   :  { %676 = vmatpush1.bf16.msra.mxu1 %v1188_v3  ;;  %v1209_v3 = vld [vmem:[#allocation6 + $0x60] sm:$0xff]  }
  0x75   :  { %713 = vmatpush1.bf16.msra.mxu0 %v1179_v62  ;;  %677 = vmatprep.subr.bf16.mxu1 %v1189_v4  ;;  %v1210_v4 = vld [vmem:[#allocation6 + $0x20] sm:$0xff]  }
  0x76   :  { %714 = vmatprep.subr.bf16.mxu0 %v1187_v1  ;;  %v1207_v1 = vld [vmem:[#allocation6 + $0x58] sm:$0xff]  }
  0x78   :  { %678 = vmatpush1.bf16.msra.mxu1 %v1194_v7  ;;  %v1213_v7 = vld [vmem:[#allocation6 + $0x70] sm:$0xff]  }
  0x79   :  { %715 = vmatpush1.bf16.msra.mxu0 %v1185_v2  ;;  %1053 = vmatprep.subr.bf16.mxu1 %v1201_v12  ;;  %v1208_v2 = vld [vmem:[#allocation6 + $0x18] sm:$0xff]  }
  0x7a   :  { %716 = vmatprep.subr.bf16.mxu0 %v1193_v5  ;;  %v1211_v5 = vld [vmem:[#allocation6 + $0x68] sm:$0xff]  }
  0x7d   :  { %717 = vmatpush1.bf16.msra.mxu0 %v1191_v6  ;;  %v1212_v6 = vld [vmem:[#allocation6 + $0x28] sm:$0xff]  }
  0x7e   :  { %718 = vmatprep.subr.bf16.mxu0 %v1197_v8  ;;  %v1214_v8 = vld [vmem:[#allocation6 + $0x30] sm:$0xff]  }
  0x81   :  { %719 = vmatpush1.bf16.msra.mxu0 %v1195_v9  ;;  %v1215_v9 = vld [vmem:[#allocation6 + $0x78] sm:$0xff]  }
  0x82   :  { %720 = vmatprep.subr.bf16.mxu0 %v1200_v10  ;;  %v1216_v10 = vld [vmem:[#allocation6 + $0x38] sm:$0xff]  }
  0x85   :  { %721 = vmatpush1.bf16.msra.mxu0 %v1198_v11  ;;  %v315_v11 = vld [vmem:[%s1419_s4] sm:$0x3] }
 0x113   :  { %v179_v20 = vpop.f32.mrb[0].mxu0 }
 0x114   :  { %v180_v21 = vadd.f32 %v179_v20, %v84_v18  ;;  %v181_v22 = vpop.f32.mrb[1].mxu0  ;;  %v324_v20 = vrot.slane %v315_v11, %v87_v17 }
 0x115   :  { %v182_v24 = vadd.f32 %v181_v22, %v88_v19  ;;  %v183_v25 = vpop.f32.mrb[2].mxu0 }
 0x116   :  { %v231_v27 = vmul.f32 0.2, %v180_v21  ;;  %v184_v28 = vadd.f32 %v183_v25, %v84_v18  ;;  %v185_v29 = vpop.f32.mrb[3].mxu0  ;;  %v320_v18 = vrot.slane %v315_v11, %v83_v15 }
 0x117   :  { %v232_v30 = vmul.f32 0.2, %v182_v24  ;;  %v186_v31 = vadd.f32 %v185_v29, %v88_v19 }
 0x118   :  { %v235_v32 = vmul.f32 0.2, %v184_v28  ;;  %v239_v36 = vmax.f32 %v180_v21, %v231_v27 }
 0x119   :  { %v236_v34 = vmul.f32 0.2, %v186_v31  ;;  %v240_v39 = vmax.f32 %v182_v24, %v232_v30 }
 0x11a   :  { %v243_v37 = vmax.f32 %v184_v28, %v235_v32 }
 0x11b   :  { %v222_v38 = vpop.f32.mrb[4].mxu0  ;;  %v244_v40 = vmax.f32 %v186_v31, %v236_v34 }
 0x11c   :  { %v223_v41 = vadd.f32 %v222_v38, %v92_v33  ;;  %v224_v42 = vpop.f32.mrb[5].mxu0  ;;  %v247_v43 = vpack.c.bf16 %v243_v37, %v239_v36 }
 0x11d   :  { %v225_v44 = vadd.f32 %v224_v42, %v96_v35  ;;  %v226_v45 = vpop.f32.mrb[6].mxu0  ;;  %v248_v46 = vpack.c.bf16 %v244_v40, %v240_v39  ;;  %v1027_v42 = vld [vmem:[%s1421_s6] ss:$0 sm:$0xff] }
 0x11e   :  { %v233_v48 = vmul.f32 0.2, %v223_v41  ;;  %v227_v49 = vadd.f32 %v226_v45, %v92_v33  ;;  %v228_v50 = vpop.f32.mrb[7].mxu0 }
 0x11f   :  { %v234_v52 = vmul.f32 0.2, %v225_v44  ;;  %v229_v53 = vadd.f32 %v228_v50, %v96_v35  ;;  %679 = vmatprep.mubr.bf16.mxu1 %v248_v46 }
 0x120   :  { %v237_v54 = vmul.f32 0.2, %v227_v49  ;;  %680 = vmatmul.mubr.bf16.vlgmr.msra.gmra.mrb[0].mxu1 %v247_v43  ;;  %v241_v57 = vmax.f32 %v223_v41, %v233_v48 }
 0x121   :  { %v238_v55 = vmul.f32 0.2, %v229_v53  ;;  %1054 = vmatpush3.bf16.msra.mxu1 %v1202_v47  ;;  %v242_v60 = vmax.f32 %v225_v44, %v234_v52 }
 0x122   :  { %v245_v58 = vmax.f32 %v227_v49, %v237_v54  ;;  %1055 = vmatprep.subr.bf16.mxu1 %v1203_v51 }
 0x123   :  { %v246_v61 = vmax.f32 %v229_v53, %v238_v55 }
 0x124   :  { %v249_v62 = vpack.c.bf16 %v245_v58, %v241_v57 }
 0x125   :  { %v250_v63 = vpack.c.bf16 %v246_v61, %v242_v60  ;;  %1056 = vmatpush3.bf16.msra.mxu1 %v1204_v56 }
 0x126   :  { %1057 = vmatprep.subr.bf16.mxu1 %v1205_v59 }
 0x127   :  { %722 = vmatprep.mubr.bf16.mxu0 %v250_v63 }
 0x128   :  { %723 = vmatmul.mubr.bf16.vlgmr.msra.gmra.mrb[8].mxu0 %v249_v62 }
 0x129   :  { %1058 = vmatpush3.bf16.msra.mxu1 %v1206_v0 }
 0x12a   :  { %1059 = vmatprep.subr.bf16.mxu1 %v1207_v1 }
 0x12d   :  { %1060 = vmatpush3.bf16.msra.mxu1 %v1208_v2 }
 0x12e   :  { %1061 = vmatprep.subr.bf16.mxu1 %v1209_v3 }
 0x131   :  { %1062 = vmatpush3.bf16.msra.mxu1 %v1210_v4 }
 0x132   :  { %1063 = vmatprep.subr.bf16.mxu1 %v1211_v5 }
 0x135   :  { %1064 = vmatpush3.bf16.msra.mxu1 %v1212_v6 }
 0x136   :  { %1065 = vmatprep.subr.bf16.mxu1 %v1213_v7 }
 0x139   :  { %1066 = vmatpush3.bf16.msra.mxu1 %v1214_v8 }
 0x13a   :  { %1067 = vmatprep.subr.bf16.mxu1 %v1215_v9 }
 0x13d   :  { %1068 = vmatpush3.bf16.msra.mxu1 %v1216_v10 }
 0x1f3   :  { %v681_v12 = vpop.f32.mrb[0].mxu1 }
 0x1f4   :  { %v683_v13 = vpop.f32.mrb[1].mxu1  ;;  %v682_v21 = vadd.f32 %v681_v12, %v320_v18 }
 0x1f5   :  { %v685_v16 = vpop.f32.mrb[2].mxu1  ;;  %v684_v22 = vadd.f32 %v683_v13, %v324_v20 }
 0x1f6   :  { %v687_v19 = vpop.f32.mrb[3].mxu1  ;;  %v686_v24 = vadd.f32 %v685_v16, %v320_v18 }
 0x1f7   :  { %v688_v27 = vadd.f32 %v687_v19, %v324_v20 }
 0x1fb   :  { %v724_v23 = vpop.f32.mrb[8].mxu0 }
 0x1fc   :  { %v725_v25 = vadd.f32 %v724_v23, %v682_v21  ;;  %v726_v26 = vpop.f32.mrb[9].mxu0 }
 0x1fd   :  { %v727_v28 = vadd.f32 %v726_v26, %v684_v22  ;;  %v728_v29 = vpop.f32.mrb[10].mxu0 }
 0x1fe   :  { %v733_v30 = vmul.f32 0.2, %v725_v25  ;;  %v729_v31 = vadd.f32 %v728_v29, %v686_v24  ;;  %v730_v32 = vpop.f32.mrb[11].mxu0 }
 0x1ff   :  { %v734_v33 = vmul.f32 0.2, %v727_v28  ;;  %v731_v34 = vadd.f32 %v730_v32, %v688_v27 }
 0x200   :  { %v735_v35 = vmul.f32 0.2, %v729_v31  ;;  %v737_v36 = vmax.f32 %v725_v25, %v733_v30 }
 0x201   :  { %v736_v15 = vmul.f32 0.2, %v731_v34  ;;  %v738_v14 = vmax.f32 %v727_v28, %v734_v33 }
 0x202   :  { %v739_v37 = vmax.f32 %v729_v31, %v735_v35 }
 0x203   :  { %v740_v17 = vmax.f32 %v731_v34, %v736_v15 }
 0x204   :  { %v741_v38 = vpack.c.bf16 %v739_v37, %v737_v36 }
 0x205   :  { %v742_v39 = vpack.c.bf16 %v740_v17, %v738_v14 }
 0x207   :  { %910 = vmatprep.mubr.bf16.mxu1 %v742_v39 }
 0x208   :  { %911 = vmatmul.mubr.bf16.vlgmr.msra.gmra.mrb[4].mxu1 %v741_v38 }
 0x2db   :  { %v1069_v40 = vpop.f32.mrb[4].mxu1 }
 0x2dc   :  { %v1070_v41 = vpop.f32.mrb[5].mxu1 }
 0x2dd   :  { %v1071_v43 = vadd.f32 %v1070_v41, %v1069_v40  ;;  %v1072_v44 = vpop.f32.mrb[6].mxu1 }
 0x2de   :  { %v1073_v45 = vpop.f32.mrb[7].mxu1 }
 0x2df   :  { %v1074_v46 = vadd.f32 %v1073_v45, %v1072_v44  ;;  %v913_v47 = vadd.f32 %v1071_v43, %v1027_v42 }
 0x2e1   :  { %919 = vmax.xlane.f32.xlu0 %v913_v47  ;;  %v916_v48 = vadd.f32 %v1074_v46, %v1027_v42 }
 0x2e5   :  { %921 = vmax.xlane.f32.xlu0 %v916_v48 }
 0x36e   :  { %v920_v49 = vpop.xlane.xlu0 %919 }
 0x36f   :  { %v923_v50 = vsub.f32 %v913_v47, %v920_v49 }
 0x371   :  { %v925_v51 = vmul.f32 1.442695, %v923_v50 }
 0x372   :  { %v922_v52 = vpop.xlane.xlu0 %921 }
 0x373   :  { %1217 = vpow2.f32 %v925_v51  ;;  %v924_v53 = vsub.f32 %v916_v48, %v922_v52 }
 0x375   :  { %v927_v54 = vmul.f32 1.442695, %v924_v53 }
 0x377   :  { %1219 = vpow2.f32 %v927_v54 }
 0x37d   :  { %v1218_v55 = vpop.eup %1217 }
 0x37e   :  { %929 = vadd.xlane.f32.xlu1 %v1218_v55 }
 0x381   :  { %v1220_v56 = vpop.eup %1219 }
 0x382   :  { %931 = vadd.xlane.f32.xlu1 %v1220_v56 }
 0x40b   :  { %v930_v57 = vpop.xlane.xlu1 %929 }
 0x40c   :  { %1221 = vrcp.f32 %v930_v57 }
 0x40f   :  { %v932_v58 = vpop.xlane.xlu1 %931 }
 0x410   :  { %1223 = vrcp.f32 %v932_v58 }
 0x416   :  { %v1222_v59 = vpop.eup %1221 }
 0x417   :  { %v935_v61 = vmul.f32 %v1222_v59, %v1218_v55 }
 0x41a   :  { %v1224_v60 = vpop.eup %1223 }
 0x41b   :  { %v936_v62 = vmul.f32 %v1224_v60, %v1220_v56 }
 0x41d   :  { %v1051_v63 = vpack.c.bf16 %v936_v62, %v935_v61 }
 0x41f   :  { %1052 = vst [vmem:[%s1422_s7] sm:$0xff] %v1051_v63  }
 0x420   :  { %951 = vsyncpa [#allocation3], 1 }
 0x421   :  { %952 = vsyncpa [#allocation5], 1 }

</bundles_post_ra>
